<compile_context>
chip_gen: v6e
topology: v6e:2x2x1
jax: 0.10.0
libtpu: 0.0.40
codegen_flags: <defaults>
</compile_context>

<pallas_src>
import functools

import jax
import jax.numpy as jnp
from jax import lax
from jax.experimental import pallas as pl
from jax.experimental.pallas import tpu as pltpu


def _leaky_relu(x, slope=0.001):
    # matches nn.LeakyReLU(negative_slope=0.001)
    return jnp.where(x > 0, x, slope * x)


def _round_up(n, m):
    return ((n + m - 1) // m) * m


def _cdiv(a, b):
    return (a + b - 1) // b


# ----------------------------------------------------------------------------
# Kernel
# ----------------------------------------------------------------------------
def _fitting_net_kernel(x_ref, w1_ref, b1_ref, wh_ref, bh_ref, wl_ref, bl_ref,
                        gmask_ref, o_ref, *, nlayers, pack, out_size, last_activ):
    # ---- first layer: x @ W1 + b1 -> LeakyReLU ------------------------------
    # (cast to the weight dtype *inside* the kernel: cheap VPU pack, no extra
    #  HBM pass over x; a no-op in the default f32 path)
    out = jnp.dot(x_ref[...].astype(w1_ref.dtype), w1_ref[...],
                  preferred_element_type=jnp.float32)
    out = _leaky_relu(out + b1_ref[...])

    # ---- hidden layers: the SAME hiddenl weight applied nlayers times -------
    if nlayers > 1:
        wh = wh_ref[...]          # hoisted: read once, not per iteration
        bh = bh_ref[...]

        def hidden_step(_, h):
            h = jnp.dot(h.astype(wh.dtype), wh,
                        preferred_element_type=jnp.float32)
            return _leaky_relu(h + bh)

        if nlayers <= 8:
            # short fixed trip count: full unroll (LLO scheduler visibility)
            for _ in range(nlayers):
                out = hidden_step(None, out)
        else:
            # bounded live ranges, partially unrolled for scheduler visibility
            out = lax.fori_loop(0, nlayers, hidden_step, out, unroll=4)

    # ---- last layer (1/hidden_size already folded into wl/bl on the host) ---
    out = jnp.dot(out.astype(wl_ref.dtype), wl_ref[...],
                  preferred_element_type=jnp.float32)
    out = out + bl_ref[...]

    # ---- final activation ----------------------------------------------------
    if last_activ == "sigmoid":
        lim = 3.0 ** 0.5
        out = jnp.clip(out, -lim, lim)
        out = 0.5 * jnp.tanh(0.5 * out) + 0.5        # == sigmoid, single EUP tanh
    elif last_activ == "softmax":
        # Per-sample softmax.  Samples are lane-packed `pack` per row with
        # `out_size` lanes each; subtracting the row max (>= every group max)
        # is a valid per-group shift and keeps exp() bounded.
        m = jnp.max(out, axis=-1, keepdims=True)
        e = jnp.exp(out - m)
        if pack > 1:
            # per-group sum, broadcast within each group, via a tiny block-
            # diagonal ones-mask matmul (host-built constant, MXU, ~free)
            s = jnp.dot(e, gmask_ref[...], preferred_element_type=jnp.float32)
        else:
            s = jnp.sum(e, axis=-1, keepdims=True)
        out = e / s                                   # exact normalization
    else:
        out = _leaky_relu(out)

    o_ref[...] = out.astype(o_ref.dtype)


# ----------------------------------------------------------------------------
# Host-side parameter preparation (block-diagonal packing, scale folding)
# ----------------------------------------------------------------------------
def _prepare_params(params, *, nlayers, pack, hidden_size, use_bf16):
    w1, b1 = params["w1"], params["b1"]
    wl, bl = params["wl"], params["bl"]

    # fold the forward's divide-by-hidden_size into the last layer (removes a
    # VPU multiply over the output tile on every grid step)
    inv_h = 1.0 / float(hidden_size)
    wl = wl * inv_h
    bl = bl * inv_h

    if nlayers > 1:
        wh, bh = params["wh"], params["bh"]
    else:
        wh = jnp.zeros((1, 1), jnp.float32)   # never read (static nlayers)
        bh = jnp.zeros((1, 1), jnp.float32)

    if pack > 1:
        eye = jnp.eye(pack, dtype=jnp.float32)
        w1 = jnp.kron(eye, w1)                 # (pack*in, pack*hidden)
        wl = jnp.kron(eye, wl)                 # (pack*hidden, pack*out)
        b1 = jnp.tile(b1, (1, pack))
        bl = jnp.tile(bl, (1, pack))
        if nlayers > 1:
            wh = jnp.kron(eye, wh)             # (pack*hidden, pack*hidden)
            bh = jnp.tile(bh, (1, pack))

    if use_bf16:
        # weights only; biases / elementwise / accumulation stay f32
        w1 = w1.astype(jnp.bfloat16)
        wl = wl.astype(jnp.bfloat16)
        if nlayers > 1:
            wh = wh.astype(jnp.bfloat16)

    return w1, b1, wh, bh, wl, bl


def _choose_tile_rows(n_rows, batch_tile, pack, p_in, p_hid, p_out):
    """Pick the number of packed rows per grid step.

    Large enough to amortize the ~0.35us per-step pipeline overhead, bounded by
    a VMEM byte budget that stays comfortably inside the scoped limit on every
    generation (v7x: 64 MiB physical), and capped so that the ("parallel",)
    grid has >=2 steps when possible (v7x megacore sharding)."""
    budget = 12 * 1024 * 1024                          # activations + dbl-buffered x/out
    bytes_per_row = 4 * (2 * p_in + 2 * p_hid + 2 * p_out)
    rows_budget = max(8, budget // bytes_per_row)
    rows_req = max(8, _cdiv(batch_tile, pack))
    tile = min(rows_req, rows_budget, _round_up(n_rows, 8))
    tile = max(8, _round_up(tile, 8))
    if tile >= n_rows and n_rows > 8:
        # whole batch would fit in one step: split so both v7x TCs get work
        tile = _round_up(_cdiv(n_rows, 2), 8)
    return tile


# ----------------------------------------------------------------------------
# Forward wrapper
# ----------------------------------------------------------------------------
def fitting_net_forward(x, params, *, nlayers, hidden_size, last_activ=None,
                        batch_tile=32768, pack=None, use_bf16=False):
    """x: (B, input_size) float32.  params: dict of w1,b1,wh,bh,wl,bl.

    batch_tile: target samples per grid step (the actual tile is derived from a
    VMEM byte budget).  pack: samples lane-packed per row (default 128//in).
    use_bf16: bf16 MXU operands (v6e/v7x); keep False on v5e / deep nets."""
    B, in_size = x.shape
    out_size = params["wl"].shape[1]

    if pack is None:
        pack = max(1, 128 // in_size)     # make x rows lane-dense

    # Pack the batch: (B, in) -> (n_rows, pack*in).  The reshape is a free
    # row-major merge; padding (if any) is < pack rows, i.e. negligible traffic
    # (unlike the old tile-sized pad).
    Bp = _round_up(B, pack)
    if Bp != B:
        x = jnp.pad(x, ((0, Bp - B), (0, 0)))
    n_rows = Bp // pack
    xp = x.reshape(n_rows, pack * in_size)

    w1, b1, wh, bh, wl, bl = _prepare_params(
        params, nlayers=nlayers, pack=pack, hidden_size=hidden_size,
        use_bf16=use_bf16)

    if last_activ == "softmax" and pack > 1:
        # block-diagonal group-membership mask for the packed per-sample softmax
        gmask = jnp.kron(jnp.eye(pack, dtype=jnp.float32),
                         jnp.ones((out_size, out_size), jnp.float32))
    else:
        gmask = jnp.zeros((1, 1), jnp.float32)   # never read

    p_in, p_hid, p_out = pack * in_size, pack * hidden_size, pack * out_size
    tile = _choose_tile_rows(n_rows, batch_tile, pack, p_in, p_hid, p_out)
    grid = _cdiv(n_rows, tile)     # partial last block handled by Pallas masking

    kernel = functools.partial(
        _fitting_net_kernel,
        nlayers=nlayers, pack=pack, out_size=out_size, last_activ=last_activ)

    # Weights/biases/mask: constant block index -> Pallas keeps them resident
    # and does not re-issue their DMA on later grid steps.
    const_spec = lambda a: pl.BlockSpec(a.shape, lambda i: (0, 0))

    out = pl.pallas_call(
        kernel,
        out_shape=jax.ShapeDtypeStruct((n_rows, p_out), jnp.float32),
        grid_spec=pltpu.PrefetchScalarGridSpec(
            num_scalar_prefetch=0,
            grid=(grid,),
            in_specs=[
                pl.BlockSpec((tile, p_in), lambda i: (i, 0)),   # packed x
                const_spec(w1), const_spec(b1),
                const_spec(wh), const_spec(bh),
                const_spec(wl), const_spec(bl),
                const_spec(gmask),
            ],
            out_specs=pl.BlockSpec((tile, p_out), lambda i: (i, 0)),
        ),
        compiler_params=pltpu.CompilerParams(
            # batch rows are embarrassingly parallel -> megacore sharding (v7x)
            dimension_semantics=("parallel",),
            # raise v5e's 16 MiB scoped default; <=48 MiB keeps >=25% headroom
            # on v7x's 64 MiB physical VMEM
            vmem_limit_bytes=48 * 1024 * 1024,
        ),
    )(xp, w1, b1, wh, bh, wl, bl, gmask)

    out = out.reshape(Bp, out_size)     # unpack: consecutive samples per row
    return out[:B] if Bp != B else out


# ----------------------------------------------------------------------------
# Parameter init + pure-JAX reference (mirrors the PyTorch module)
# ----------------------------------------------------------------------------
def init_params(key, input_size, hidden_size, output_size):
    """Mirror of FittingNet.__init__: weights ~ N(0,1); biases use PyTorch's
    default Linear init U(-1/sqrt(fan_in), 1/sqrt(fan_in))."""
    k = jax.random.split(key, 6)
    bound1 = 1.0 / jnp.sqrt(jnp.float32(input_size))
    boundh = 1.0 / jnp.sqrt(jnp.float32(hidden_size))
    return {
        # stored (in, out) == transpose of torch's (out, in)
        "w1": jax.random.normal(k[0], (input_size, hidden_size), jnp.float32),
        "b1": jax.random.uniform(k[1], (1, hidden_size), jnp.float32,
                                 minval=-bound1, maxval=bound1),
        "wh": jax.random.normal(k[2], (hidden_size, hidden_size), jnp.float32),
        "bh": jax.random.uniform(k[3], (1, hidden_size), jnp.float32,
                                 minval=-boundh, maxval=boundh),
        "wl": jax.random.normal(k[4], (hidden_size, output_size), jnp.float32),
        "bl": jax.random.uniform(k[5], (1, output_size), jnp.float32,
                                 minval=-boundh, maxval=boundh),
    }


def fitting_net_ref(x, params, *, nlayers, hidden_size, last_activ=None):
    """Pure-JAX reference matching the PyTorch forward."""
    out = _leaky_relu(x @ params["w1"] + params["b1"])
    if nlayers > 1:
        for _ in range(nlayers):
            out = _leaky_relu(out @ params["wh"] + params["bh"])
    out = (out @ params["wl"] + params["bl"]) / float(hidden_size)
    if last_activ == "sigmoid":
        lim = jnp.sqrt(3.0)
        out = jax.nn.sigmoid(jnp.clip(out, -lim, lim))
    elif last_activ == "softmax":
        out = jax.nn.softmax(out, axis=1)
    else:
        out = _leaky_relu(out)
    return out


if __name__ == "__main__":
    key = jax.random.PRNGKey(0)
    kx, kp = jax.random.split(key)

    # Small shapes consistent with the module.  batch=200, pack=8 -> 25 packed
    # rows -> megacore cap gives tile=16 -> a 2-step grid with a partial last
    # block, exercising the OOB-masked tail path.
    batch, input_size, hidden_size, output_size, nlayers = 200, 16, 32, 8, 2

    x = jax.random.normal(kx, (batch, input_size), jnp.float32)
    params = init_params(kp, input_size, hidden_size, output_size)

    ok = True

    # f32 packed path (default): check against the pure-JAX reference.
    for activ in (None, "sigmoid", "softmax"):
        out = fitting_net_forward(x, params, nlayers=nlayers,
                                  hidden_size=hidden_size, last_activ=activ)
        out = jax.block_until_ready(out)
        ref = fitting_net_ref(x, params, nlayers=nlayers,
                              hidden_size=hidden_size, last_activ=activ)
        tol = 1e-3 if activ == "softmax" else 1e-4
        if out.shape != ref.shape or not jnp.allclose(out, ref, atol=tol, rtol=tol):
            ok = False

    # unpacked fallback path (pack=1), covers the row-wise softmax branch.
    out_u = fitting_net_forward(x, params, nlayers=nlayers,
                                hidden_size=hidden_size, last_activ="softmax",
                                pack=1)
    out_u = jax.block_until_ready(out_u)
    ref_sm = fitting_net_ref(x, params, nlayers=nlayers,
                             hidden_size=hidden_size, last_activ="softmax")
    if not jnp.allclose(out_u, ref_sm, atol=1e-3, rtol=1e-3):
        ok = False

    # bf16 MXU fast path (v6e/v7x): loose tolerance vs the f32 reference.
    out_b = fitting_net_forward(x, params, nlayers=nlayers,
                                hidden_size=hidden_size, last_activ="sigmoid",
                                use_bf16=True)
    out_b = jax.block_until_ready(out_b)
    ref_sig = fitting_net_ref(x, params, nlayers=nlayers,
                              hidden_size=hidden_size, last_activ="sigmoid")
    if not jnp.allclose(out_b, ref_sig, atol=0.1, rtol=0.1):
        ok = False

    if ok:
        print("KERNEL_OK")
</pallas_src>

<mosaic_0001>
module attributes {stable_mosaic.version = 11 : i64} {
  func.func @_fitting_net_kernel(%arg0: i32, %arg1: memref<16x128xf32, #tpu.memory_space<vmem>>, %arg2: memref<128x256xf32, #tpu.memory_space<vmem>>, %arg3: memref<1x256xf32, #tpu.memory_space<vmem>>, %arg4: memref<256x256xf32, #tpu.memory_space<vmem>>, %arg5: memref<1x256xf32, #tpu.memory_space<vmem>>, %arg6: memref<256x64xf32, #tpu.memory_space<vmem>>, %arg7: memref<1x64xf32, #tpu.memory_space<vmem>>, %arg8: memref<1x1xf32, #tpu.memory_space<vmem>>, %arg9: memref<16x64xf32, #tpu.memory_space<vmem>>) attributes {dimension_semantics = [#tpu.dimension_semantics<parallel>], iteration_bounds = array<i64: 2>, scalar_prefetch = 0 : i64, scratch_operands = 0 : i64, tpu.core_type = #tpu.core_type<tc>, window_params = [{transform_indices = @transform_0, window_bounds = array<i64: 16, 128>}, {pipeline_mode = #tpu.pipeline_mode<synchronous>, transform_indices = @transform_1, window_bounds = array<i64: 128, 256>}, {pipeline_mode = #tpu.pipeline_mode<synchronous>, transform_indices = @transform_2, window_bounds = array<i64: 1, 256>}, {pipeline_mode = #tpu.pipeline_mode<synchronous>, transform_indices = @transform_3, window_bounds = array<i64: 256, 256>}, {pipeline_mode = #tpu.pipeline_mode<synchronous>, transform_indices = @transform_4, window_bounds = array<i64: 1, 256>}, {pipeline_mode = #tpu.pipeline_mode<synchronous>, transform_indices = @transform_5, window_bounds = array<i64: 256, 64>}, {pipeline_mode = #tpu.pipeline_mode<synchronous>, transform_indices = @transform_6, window_bounds = array<i64: 1, 64>}, {pipeline_mode = #tpu.pipeline_mode<synchronous>, transform_indices = @transform_7, window_bounds = array<i64: 1, 1>}, {transform_indices = @transform_8, window_bounds = array<i64: 16, 64>}]} {
    %c0 = arith.constant 0 : index
    %c0_0 = arith.constant 0 : index
    %0 = vector.load %arg1[%c0, %c0_0] : memref<16x128xf32, #tpu.memory_space<vmem>>, vector<16x128xf32>
    %c0_1 = arith.constant 0 : index
    %c0_2 = arith.constant 0 : index
    %1 = vector.load %arg2[%c0_1, %c0_2] : memref<128x256xf32, #tpu.memory_space<vmem>>, vector<128x256xf32>
    %cst = arith.constant dense<0.000000e+00> : vector<16x256xf32>
    %2 = tpu.matmul %0, %1, %cst {dimension_numbers = #tpu.dot_dimension_numbers<[1], [0], [0], [1], [0, 0, 1, 1], [], []>} : vector<16x128xf32>, vector<128x256xf32>, vector<16x256xf32> -> vector<16x256xf32>
    %c0_3 = arith.constant 0 : index
    %c0_4 = arith.constant 0 : index
    %3 = vector.load %arg3[%c0_3, %c0_4] : memref<1x256xf32, #tpu.memory_space<vmem>>, vector<1x256xf32>
    %4 = vector.broadcast %3 : vector<1x256xf32> to vector<16x256xf32>
    %5 = arith.addf %2, %4 : vector<16x256xf32>
    %cst_5 = arith.constant 0.000000e+00 : f32
    %6 = vector.broadcast %cst_5 : f32 to vector<16x256xf32>
    %7 = arith.cmpf ogt, %5, %6 : vector<16x256xf32>
    %cst_6 = arith.constant 1.000000e-03 : f32
    %8 = vector.broadcast %cst_6 : f32 to vector<16x256xf32>
    %9 = arith.mulf %8, %5 : vector<16x256xf32>
    %10 = arith.select %7, %5, %9 : vector<16x256xi1>, vector<16x256xf32>
    %c0_7 = arith.constant 0 : index
    %c0_8 = arith.constant 0 : index
    %11 = vector.load %arg4[%c0_7, %c0_8] : memref<256x256xf32, #tpu.memory_space<vmem>>, vector<256x256xf32>
    %c0_9 = arith.constant 0 : index
    %c0_10 = arith.constant 0 : index
    %12 = vector.load %arg5[%c0_9, %c0_10] : memref<1x256xf32, #tpu.memory_space<vmem>>, vector<1x256xf32>
    %cst_11 = arith.constant dense<0.000000e+00> : vector<16x256xf32>
    %13 = tpu.matmul %10, %11, %cst_11 {dimension_numbers = #tpu.dot_dimension_numbers<[1], [0], [0], [1], [0, 0, 1, 1], [], []>} : vector<16x256xf32>, vector<256x256xf32>, vector<16x256xf32> -> vector<16x256xf32>
    %14 = vector.broadcast %12 : vector<1x256xf32> to vector<16x256xf32>
    %15 = arith.addf %13, %14 : vector<16x256xf32>
    %cst_12 = arith.constant 0.000000e+00 : f32
    %16 = vector.broadcast %cst_12 : f32 to vector<16x256xf32>
    %17 = arith.cmpf ogt, %15, %16 : vector<16x256xf32>
    %cst_13 = arith.constant 1.000000e-03 : f32
    %18 = vector.broadcast %cst_13 : f32 to vector<16x256xf32>
    %19 = arith.mulf %18, %15 : vector<16x256xf32>
    %20 = arith.select %17, %15, %19 : vector<16x256xi1>, vector<16x256xf32>
    %cst_14 = arith.constant dense<0.000000e+00> : vector<16x256xf32>
    %21 = tpu.matmul %20, %11, %cst_14 {dimension_numbers = #tpu.dot_dimension_numbers<[1], [0], [0], [1], [0, 0, 1, 1], [], []>} : vector<16x256xf32>, vector<256x256xf32>, vector<16x256xf32> -> vector<16x256xf32>
    %22 = vector.broadcast %12 : vector<1x256xf32> to vector<16x256xf32>
    %23 = arith.addf %21, %22 : vector<16x256xf32>
    %cst_15 = arith.constant 0.000000e+00 : f32
    %24 = vector.broadcast %cst_15 : f32 to vector<16x256xf32>
    %25 = arith.cmpf ogt, %23, %24 : vector<16x256xf32>
    %cst_16 = arith.constant 1.000000e-03 : f32
    %26 = vector.broadcast %cst_16 : f32 to vector<16x256xf32>
    %27 = arith.mulf %26, %23 : vector<16x256xf32>
    %28 = arith.select %25, %23, %27 : vector<16x256xi1>, vector<16x256xf32>
    %c0_17 = arith.constant 0 : index
    %c0_18 = arith.constant 0 : index
    %29 = vector.load %arg6[%c0_17, %c0_18] : memref<256x64xf32, #tpu.memory_space<vmem>>, vector<256x64xf32>
    %cst_19 = arith.constant dense<0.000000e+00> : vector<16x64xf32>
    %30 = tpu.matmul %28, %29, %cst_19 {dimension_numbers = #tpu.dot_dimension_numbers<[1], [0], [0], [1], [0, 0, 1, 1], [], []>} : vector<16x256xf32>, vector<256x64xf32>, vector<16x64xf32> -> vector<16x64xf32>
    %c0_20 = arith.constant 0 : index
    %c0_21 = arith.constant 0 : index
    %31 = vector.load %arg7[%c0_20, %c0_21] : memref<1x64xf32, #tpu.memory_space<vmem>>, vector<1x64xf32>
    %32 = vector.broadcast %31 : vector<1x64xf32> to vector<16x64xf32>
    %33 = arith.addf %30, %32 : vector<16x64xf32>
    %cst_22 = arith.constant 0.000000e+00 : f32
    %34 = vector.broadcast %cst_22 : f32 to vector<16x64xf32>
    %35 = arith.cmpf ogt, %33, %34 : vector<16x64xf32>
    %cst_23 = arith.constant 1.000000e-03 : f32
    %36 = vector.broadcast %cst_23 : f32 to vector<16x64xf32>
    %37 = arith.mulf %36, %33 : vector<16x64xf32>
    %38 = arith.select %35, %33, %37 : vector<16x64xi1>, vector<16x64xf32>
    %c0_24 = arith.constant 0 : index
    %c0_25 = arith.constant 0 : index
    %39 = vector.load %arg9[%c0_24, %c0_25] : memref<16x64xf32, #tpu.memory_space<vmem>>, vector<16x64xf32>
    tpu.vector_store %arg9[%c0_24, %c0_25], %38 {strides = array<i32>} : memref<16x64xf32, #tpu.memory_space<vmem>>, vector<16x64xf32>,
    return
  }
  func.func @transform_0(%arg0: i32) -> (i32, i32) {
    %c0_i32 = arith.constant 0 : i32
    %c0_i32_0 = arith.constant 0 : i32
    return %arg0, %c0_i32 : i32, i32
  }
  func.func @transform_1(%arg0: i32) -> (i32, i32) {
    %c0_i32 = arith.constant 0 : i32
    %c0_i32_0 = arith.constant 0 : i32
    %c0_i32_1 = arith.constant 0 : i32
    return %c0_i32, %c0_i32_0 : i32, i32
  }
  func.func @transform_2(%arg0: i32) -> (i32, i32) {
    %c0_i32 = arith.constant 0 : i32
    %c0_i32_0 = arith.constant 0 : i32
    %c0_i32_1 = arith.constant 0 : i32
    return %c0_i32, %c0_i32_0 : i32, i32
  }
  func.func @transform_3(%arg0: i32) -> (i32, i32) {
    %c0_i32 = arith.constant 0 : i32
    %c0_i32_0 = arith.constant 0 : i32
    %c0_i32_1 = arith.constant 0 : i32
    return %c0_i32, %c0_i32_0 : i32, i32
  }
  func.func @transform_4(%arg0: i32) -> (i32, i32) {
    %c0_i32 = arith.constant 0 : i32
    %c0_i32_0 = arith.constant 0 : i32
    %c0_i32_1 = arith.constant 0 : i32
    return %c0_i32, %c0_i32_0 : i32, i32
  }
  func.func @transform_5(%arg0: i32) -> (i32, i32) {
    %c0_i32 = arith.constant 0 : i32
    %c0_i32_0 = arith.constant 0 : i32
    %c0_i32_1 = arith.constant 0 : i32
    return %c0_i32, %c0_i32_0 : i32, i32
  }
  func.func @transform_6(%arg0: i32) -> (i32, i32) {
    %c0_i32 = arith.constant 0 : i32
    %c0_i32_0 = arith.constant 0 : i32
    %c0_i32_1 = arith.constant 0 : i32
    return %c0_i32, %c0_i32_0 : i32, i32
  }
  func.func @transform_7(%arg0: i32) -> (i32, i32) {
    %c0_i32 = arith.constant 0 : i32
    %c0_i32_0 = arith.constant 0 : i32
    %c0_i32_1 = arith.constant 0 : i32
    return %c0_i32, %c0_i32_0 : i32, i32
  }
  func.func @transform_8(%arg0: i32) -> (i32, i32) {
    %c0_i32 = arith.constant 0 : i32
    %c0_i32_0 = arith.constant 0 : i32
    return %arg0, %c0_i32 : i32, i32
  }
}

</mosaic_0001>

<bundles_post_ra>
// kernel: tpu_custom_call.1
= control target key start
LH: loop header
LB: loop body
LE: loop exit
PB: predicated region body
PF: predicated region fallthrough
CT: control target
= control target key end

     0   :  { %15 = vsyncpa [#allocation4], 0  ;;  %s1676_s0 = inlined_call_operand.vmem [shape: f32[25,128], index: 0, kind: input, shape index: {}]   ;;  %s1677_s1 = inlined_call_operand.vmem [shape: f32[128,256], index: 1, kind: input, shape index: {}]   ;;  %s1678_s2 = inlined_call_operand.vmem [shape: f32[1,256], index: 2, kind: input, shape index: {}]   ;;  %s1679_s3 = inlined_call_operand.hbm [shape: f32[256,256], index: 3, kind: input, shape index: {}]   ;;  %s1680_s4 = inlined_call_operand.vmem [shape: f32[1,256], index: 4, kind: input, shape index: {}]   ;;  %s1681_s5 = inlined_call_operand.vmem [shape: f32[256,64], index: 5, kind: input, shape index: {}]   ;;  %s1682_s6 = inlined_call_operand.vmem [shape: f32[1,64], index: 6, kind: input, shape index: {}]   ;;  %s1683_s7 = inlined_call_operand.<no memory space> [shape: f32[1,1], index: 7, kind: input, shape index: {}]   ;;  %s1684_s8 = inlined_call_operand.hbm [shape: f32[25,64], index: 8, kind: output, shape index: {}]  }
   0x1   :  { %16 = vsyncpa [#allocation5], 0 }
   0x2   :  { %18 = vsyncpa [#allocation5 + $0x1], 0  ;;  %s1177_s27 = smov 0   ;;  %s1179_s28 = smov 0  }
   0x3   :  { %s1181_s29 = smov 0   ;;  %s1183_s30 = smov 0  }
   0x4 LB: > { %s1198_s7 = sadd.s32 4294967295, %s1123_s30   ;;  %s924_s9 = sadd.s32 4294967294, %s1123_s30   ;;  %s1123_s30 = sphi %s1183_s30, %s1693_s30   ;;  %s1119_s29 = sphi %s1181_s29, %s1692_s29   ;;  %s1115_s28 = sphi %s1179_s28, %s1691_s28   ;;  %s1111_s27 = sphi %s1177_s27, %s1690_s27  }
   0x5   : > { %s1202_s10 = sadd.s32 1, %s1123_s30   ;;  %s204_s11 = sadd.s32 1, %s1119_s29 }
   0x6   : > { %s201_s12 = ssub.s32 %s1123_s30, %s1202_s10  ;;  %p214_p0 = scmp.ne.s32.totalorder %s1119_s29, %s1115_s28 }
   0x7   : > { %p202_p1 = scmp.eq.s32.totalorder %s201_s12, 0  ;;  %p215_p2 = scmp.eq.s32.totalorder %s1198_s7, 1 }
   0x8   : > { %p220_p3 = scmp.ne.s32.totalorder %s1115_s28, %s1111_s27  ;;  %p221_p4 = scmp.eq.s32.totalorder %s924_s9, 1 }
   0x9   : > { %s1213_s13 = scalar_select %p202_p1, %s1119_s29, %s204_s11  }
   0xa   : > { %p1215_p5 = por %p215_p2, %p214_p0  ;;  %p1219_p6 = por %p221_p4, %p220_p3 }
   0xb   : > { %p925_p7 = scmp.ge.s32.totalorder %s1123_s30, 1  ;;  %p228_p8 = scmp.lt.s32.totalorder %s1123_s30, 3 }
   0xc   : > { %s1686_s15 = scalar_select %p1219_p6, 1, 0 }
   0xd   : > { %p992_p9 = scmp.eq.s32.totalorder %s1198_s7, 0  ;;  %p1226_p10 = pnand %p925_p7, %p228_p8 }
   0xe   : > { %s1125_s17 = smov [#allocation3]  }
   0xf   : > { %s246_s18 = sshll.u32 %s1125_s17, 4  ;;  %p984_p11 = pneg %p1226_p10  ;;  %s247_s18 = int_to_ptr.vmem [resolvable:$true] %s246_s18 }
  0x10   : > { %s1044_s19 = scalar_lea.vmem %s247_s18, 8192  ;;  %p1052_p3 = scmp.lt.s32.totalorder %s247_s18, %s247_s18 }
  0x11   : > { %p985_p12 = pnand %p992_p9, %p984_p11  ;;  %p1045_p0 = scmp.ne.s32.totalorder %s247_s18, %s1044_s19 }
  0x12   : > { %p1053_p4 = scmp.lt.s32.totalorder %s1044_s19, %s1044_s19 }
  0x13   : > { %p1035_p13 = pneg %p985_p12 }
  0x14   : > { %p1054_p6 = por %p1053_p4, %p1052_p3 }
  0x15   : > { %p1047_p1 = pnand %p1045_p0, %p1035_p13 }
  0x17   : > { %p1048_p2 = pneg %p1047_p1 }
  0x19   : > { %p1055_p7 = pnand %p1054_p6, %p1048_p2 }
  0x1b   : > { %1058 = shalt.err (!%p1055_p7)
}
  0x1c   : > { %s1126_s20 = smov 256   ;;  %s1127_s21 = smov 16  }
  0x1d   : > { %987 = dma.hbm_to_vmem [thread:$0]  (!%p985_p12), %s1679_s3, 8192, %s247_s18, [#allocation4], %s1126_s20, %s1126_s20, %s1127_s21  }
  0x1e   : > { %283 = sbr.rel (%p1226_p10) target bundleno = 892 (0x37c), region = 52 }
  0x23   : > { %1102 = dma.done.wait (%p992_p9), [#allocation4], 8192  }
  0x24   : > { %1104 = vsyncadd (%p992_p9), [#allocation4], 4294959104  ;;  %v1128_v0 = vmov 0.0   ;;  %v357_v1 = vld [vmem:[%s1677_s1 + $0xf8] sm:$0xff]  ;;  %v356_v2 = vld [vmem:[%s1677_s1 + $0xf0] sm:$0xff]  ;;  %s931_s11 = sshll.u32 %s1198_s7, 1 }
  0x25   : > { %434 = vmatprep.mubr.f32.mxu0 %v1128_v0  ;;  %v355_v3 = vld [vmem:[%s1677_s1 + $0xe8] sm:$0xff]  ;;  %370 = vmatprep.subr.mxu0 %v357_v1  ;;  %v354_v4 = vld [vmem:[%s1677_s1 + $0xe0] sm:$0xff]  ;;  %v353_v5 = vld [vmem:[%s1677_s1 + $0xd8] sm:$0xff]  ;;  %p1322_p6 = scmp.lt.s32.totalorder %s931_s11, 3  ;;  %s314_s23 = sand.u32 1, %s1115_s28   ;;  %vm833_vm13 = vcmask 523264  }
  0x26   : > { %371 = vmatpush1.msra.mxu0 %v356_v2  ;;  %v352_v6 = vld [vmem:[%s1677_s1 + $0xd0] sm:$0xff]  ;;  %v351_v7 = vld [vmem:[%s1677_s1 + $0xc8] sm:$0xff]  ;;  %v350_v8 = vld [vmem:[%s1677_s1 + $0xc0] sm:$0xff]  ;;  %s930_s26 = sshll.u32 %s314_s23, 4  ;;  %s939_s9 = sshll.u32 %s1198_s7, 8 }
  0x27   : > { %372 = vmatprep.subr.mxu0 %v355_v3  ;;  %v349_v9 = vld [vmem:[%s1677_s1 + $0xb8] sm:$0xff]  ;;  %v348_v10 = vld [vmem:[%s1677_s1 + $0xb0] sm:$0xff]  ;;  %v347_v11 = vld [vmem:[%s1677_s1 + $0xa8] sm:$0xff]  ;;  %s1695_s11 = smov (!%p1322_p6, %s931_s11), 3  ;;  %s316_s12 = scalar_lea.vmem [#allocation6], %s930_s26 }
  0x28   : > { %373 = vmatpush1.msra.mxu0 %v354_v4  ;;  %v346_v12 = vld [vmem:[%s1677_s1 + $0xa0] sm:$0xff]  ;;  %v345_v13 = vld [vmem:[%s1677_s1 + $0x98] sm:$0xff]  ;;  %v344_v14 = vld [vmem:[%s1677_s1 + $0x90] sm:$0xff]  ;;  %s932_s25 = sshll.u32 %s1695_s11, 3  ;;  %s850_s16 = sshll.u32 %s316_s12, 4  ;;  %s1634_s16 = int_to_ptr.vmem [resolvable:$true] %s850_s16 }
  0x29   : > { %374 = vmatprep.subr.mxu0 %v353_v5  ;;  %v1286_v15 = vld [vmem:[#allocation3 + $0xf8] sm:$0xff]  ;;  %v1288_v16 = vld [vmem:[#allocation3 + $0xf0] sm:$0xff]  ;;  %v343_v17 = vld [vmem:[%s1677_s1 + $0x88] sm:$0xff]  ;;  %s321_s20 = scalar_lea.vmem %s1676_s0, %s932_s25  ;;  %s1632_s18 = scalar_lea.hbm %s1684_s8, %s939_s9 }
  0x2a   : > { %375 = vmatpush1.msra.mxu0 %v352_v6  ;;  %535 = vmatprep.subr.mxu1 %v1286_v15  ;;  %v1294_v18 = vld [vmem:[#allocation3 + $0xe8] sm:$0xff]  ;;  %v1296_v19 = vld [vmem:[#allocation3 + $0xe0] sm:$0xff]  ;;  %v1303_v21 = vld [vmem:[#allocation3 + $0xd8] sm:$0xff]  ;;  %s1636_s7 = scalar_lea.sflag [#allocation5], %s314_s23  ;;  %s1059_s19 = scalar_lea.vmem %s1634_s16, 256 }
  0x2b   : > { %376 = vmatprep.subr.mxu0 %v351_v7  ;;  %v342_v20 = vld [vmem:[%s1677_s1 + $0x80] sm:$0xff]  ;;  %536 = vmatpush1.msra.mxu1 %v1288_v16  ;;  %v341_v22 = vld [vmem:[%s1677_s1 + $0x78] sm:$0xff]  ;;  %v1309_v23 = vld [vmem:[#allocation3 + $0xd0] sm:$0xff]  ;;  %p1060_p8 = scmp.ne.s32.totalorder %s1634_s16, %s1059_s19 }
  0x2c   : > { %377 = vmatpush1.msra.mxu0 %v350_v8  ;;  %537 = vmatprep.subr.mxu1 %v1294_v18  ;;  %v340_v24 = vld [vmem:[%s1677_s1 + $0x70] sm:$0xff]  ;;  %v1315_v25 = vld [vmem:[#allocation3 + $0xc8] sm:$0xff]  ;;  %v1327_v27 = vld [vmem:[#allocation3 + $0xc0] sm:$0xff] }
  0x2d   : > { %378 = vmatprep.subr.mxu0 %v349_v9  ;;  %538 = vmatpush1.msra.mxu1 %v1296_v19  ;;  %v339_v26 = vld [vmem:[%s1677_s1 + $0x68] sm:$0xff]  ;;  %v338_v28 = vld [vmem:[%s1677_s1 + $0x60] sm:$0xff]  ;;  %v1333_v29 = vld [vmem:[#allocation3 + $0xb8] sm:$0xff]  ;;  %p1061_p9 = pnand %p1060_p8, %p1215_p5 }
  0x2e   : > { %379 = vmatpush1.msra.mxu0 %v348_v10  ;;  %539 = vmatprep.subr.mxu1 %v1303_v21  ;;  %v337_v30 = vld [vmem:[%s1677_s1 + $0x58] sm:$0xff]  ;;  %v1339_v31 = vld [vmem:[#allocation3 + $0xb0] sm:$0xff]  ;;  %v1345_v33 = vld [vmem:[#allocation3 + $0xa8] sm:$0xff] }
  0x2f   : > { %380 = vmatprep.subr.mxu0 %v347_v11  ;;  %540 = vmatpush1.msra.mxu1 %v1309_v23  ;;  %v336_v32 = vld [vmem:[%s1677_s1 + $0x50] sm:$0xff]  ;;  %v335_v34 = vld [vmem:[%s1677_s1 + $0x48] sm:$0xff]  ;;  %v1357_v35 = vld [vmem:[#allocation3 + $0xa0] sm:$0xff]  ;;  %p1062_p10 = pneg %p1061_p9 }
  0x30   : > { %381 = vmatpush1.msra.mxu0 %v346_v12  ;;  %541 = vmatprep.subr.mxu1 %v1315_v25  ;;  %v334_v36 = vld [vmem:[%s1677_s1 + $0x40] sm:$0xff]  ;;  %v1363_v37 = vld [vmem:[#allocation3 + $0x98] sm:$0xff]  ;;  %v1369_v39 = vld [vmem:[#allocation3 + $0x90] sm:$0xff] }
  0x31   : > { %382 = vmatprep.subr.mxu0 %v345_v13  ;;  %542 = vmatpush1.msra.mxu1 %v1327_v27  ;;  %v333_v38 = vld [vmem:[%s1677_s1 + $0x38] sm:$0xff]  ;;  %v332_v40 = vld [vmem:[%s1677_s1 + $0x30] sm:$0xff]  ;;  %v1375_v41 = vld [vmem:[#allocation3 + $0x88] sm:$0xff] }
  0x32   : > { %383 = vmatpush1.msra.mxu0 %v344_v14  ;;  %543 = vmatprep.subr.mxu1 %v1333_v29  ;;  %v331_v42 = vld [vmem:[%s1677_s1 + $0x28] sm:$0xff]  ;;  %v1382_v43 = vld [vmem:[#allocation3 + $0x80] sm:$0xff]  ;;  %v1388_v45 = vld [vmem:[#allocation3 + $0x78] sm:$0xff] }
  0x33   : > { %384 = vmatprep.subr.mxu0 %v343_v17  ;;  %544 = vmatpush1.msra.mxu1 %v1339_v31  ;;  %v330_v44 = vld [vmem:[%s1677_s1 + $0x20] sm:$0xff]  ;;  %v329_v46 = vld [vmem:[%s1677_s1 + $0x18] sm:$0xff]  ;;  %v1394_v47 = vld [vmem:[#allocation3 + $0x70] sm:$0xff] }
  0x34   : > { %385 = vmatpush1.msra.mxu0 %v342_v20  ;;  %545 = vmatprep.subr.mxu1 %v1345_v33  ;;  %v328_v48 = vld [vmem:[%s1677_s1 + $0x10] sm:$0xff]  ;;  %v1403_v49 = vld [vmem:[#allocation3 + $0x68] sm:$0xff]  ;;  %v1409_v51 = vld [vmem:[#allocation3 + $0x60] sm:$0xff] }
  0x35   : > { %386 = vmatprep.subr.mxu0 %v341_v22  ;;  %546 = vmatpush1.msra.mxu1 %v1357_v35  ;;  %v327_v50 = vld [vmem:[%s1677_s1 + $0x8] sm:$0xff]  ;;  %v326_v52 = vld [vmem:[%s1677_s1] sm:$0xff]  ;;  %v1415_v53 = vld [vmem:[#allocation3 + $0x58] sm:$0xff] }
  0x36   : > { %387 = vmatpush1.msra.mxu0 %v340_v24  ;;  %547 = vmatprep.subr.mxu1 %v1363_v37  ;;  %v324_v54 = vld [vmem:[%s321_s20] sm:$0xff]  ;;  %v1418_v55 = vld [vmem:[#allocation3 + $0x50] sm:$0xff]  ;;  %v1421_v56 = vld [vmem:[#allocation3 + $0x48] sm:$0xff] }
  0x37   : > { %388 = vmatprep.subr.mxu0 %v339_v26  ;;  %548 = vmatpush1.msra.mxu1 %v1369_v39  ;;  %v1424_v57 = vld [vmem:[#allocation3 + $0x40] sm:$0xff]  ;;  %v1427_v58 = vld [vmem:[#allocation3 + $0x38] sm:$0xff]  ;;  %v325_v59 = vld [vmem:[%s321_s20 + $0x8] sm:$0xff]  ;;  %s1129_s20 = smov [#allocation6]  }
  0x38   : > { %389 = vmatpush1.msra.mxu0 %v338_v28  ;;  %549 = vmatprep.subr.mxu1 %v1375_v41  ;;  %v1431_v60 = vld [vmem:[#allocation3 + $0x30] sm:$0xff]  ;;  %v1434_v61 = vld [vmem:[#allocation3 + $0x28] sm:$0xff]  ;;  %v1438_v62 = vld [vmem:[#allocation3 + $0x20] sm:$0xff]  ;;  %s1063_s21 = sshll.u32 %s1129_s20, 4  ;;  %s1064_s21 = int_to_ptr.vmem [resolvable:$false] %s1063_s21 }
  0x39   : > { %390 = vmatprep.subr.mxu0 %v337_v30  ;;  %550 = vmatpush1.msra.mxu1 %v1382_v43  ;;  %v1442_v63 = vld [vmem:[#allocation3 + $0x18] sm:$0xff]  ;;  %v1449_v1 = vld [vmem:[#allocation3 + $0x8] sm:$0xff]  ;;  %v1453_v2 = vld [vmem:[#allocation3] sm:$0xff]  ;;  %s1065_s22 = scalar_lea.vmem %s1064_s21, 512  ;;  %p1066_p11 = scmp.lt.s32.totalorder %s1634_s16, %s1064_s21 }
  0x3a   : > { %391 = vmatpush1.msra.mxu0 %v336_v32  ;;  %551 = vmatprep.subr.mxu1 %v1388_v45  ;;  %v1457_v3 = vld [vmem:[#allocation3 + $0x1f8] sm:$0xff]  ;;  %v1461_v4 = vld [vmem:[#allocation3 + $0x1f0] sm:$0xff]  ;;  %v1465_v5 = vld [vmem:[#allocation3 + $0x1e8] sm:$0xff]  ;;  %p1067_p12 = scmp.lt.s32.totalorder %s1065_s22, %s1059_s19 }
  0x3b   : > { %392 = vmatprep.subr.mxu0 %v335_v34  ;;  %552 = vmatpush1.msra.mxu1 %v1394_v47  ;;  %v1469_v6 = vld [vmem:[#allocation3 + $0x1e0] sm:$0xff]  ;;  %v1473_v7 = vld [vmem:[#allocation3 + $0x1d8] sm:$0xff]  ;;  %v1477_v8 = vld [vmem:[#allocation3 + $0x1d0] sm:$0xff] }
  0x3c   : > { %393 = vmatpush1.msra.mxu0 %v334_v36  ;;  %553 = vmatprep.subr.mxu1 %v1403_v49  ;;  %v516_v9 = vld [vmem:[#allocation3 + $0x1c8] sm:$0xff]  ;;  %v515_v10 = vld [vmem:[#allocation3 + $0x1c0] sm:$0xff]  ;;  %v514_v11 = vld [vmem:[#allocation3 + $0x1b8] sm:$0xff]  ;;  %p1068_p13 = por %p1067_p12, %p1066_p11 }
  0x3d   : > { %394 = vmatprep.subr.mxu0 %v333_v38  ;;  %554 = vmatpush1.msra.mxu1 %v1409_v51  ;;  %v513_v12 = vld [vmem:[#allocation3 + $0x1b0] sm:$0xff]  ;;  %v512_v13 = vld [vmem:[#allocation3 + $0x1a8] sm:$0xff]  ;;  %v511_v14 = vld [vmem:[#allocation3 + $0x1a0] sm:$0xff] }
  0x3e   : > { %395 = vmatpush1.msra.mxu0 %v332_v40  ;;  %555 = vmatprep.subr.mxu1 %v1415_v53  ;;  %v508_v17 = vld [vmem:[#allocation3 + $0x188] sm:$0xff]  ;;  %v505_v20 = vld [vmem:[#allocation3 + $0x170] sm:$0xff]  ;;  %v503_v22 = vld [vmem:[#allocation3 + $0x160] sm:$0xff]  ;;  %p1069_p0 = pnand %p1068_p13, %p1062_p10 }
  0x3f   : > { %396 = vmatprep.subr.mxu0 %v331_v42  ;;  %556 = vmatpush1.msra.mxu1 %v1418_v55  ;;  %v501_v24 = vld [vmem:[#allocation3 + $0x150] sm:$0xff]  ;;  %v499_v26 = vld [vmem:[#allocation3 + $0x140] sm:$0xff] }
  0x40   : > { %397 = vmatpush1.msra.mxu0 %v330_v44  ;;  %557 = vmatprep.subr.mxu1 %v1421_v56  ;;  %v497_v28 = vld [vmem:[#allocation3 + $0x130] sm:$0xff]  ;;  %v495_v30 = vld [vmem:[#allocation3 + $0x120] sm:$0xff] }
  0x41   : > { %398 = vmatprep.subr.mxu0 %v329_v46  ;;  %558 = vmatpush1.msra.mxu1 %v1424_v57  ;;  %v493_v32 = vld [vmem:[#allocation3 + $0x110] sm:$0xff]  ;;  %v491_v34 = vld [vmem:[#allocation3 + $0x100] sm:$0xff] }
  0x42   : > { %399 = vmatpush1.msra.mxu0 %v328_v48  ;;  %559 = vmatprep.subr.mxu1 %v1427_v58  ;;  %v358_v38 = vld [vmem:[%s1678_s2] sm:$0x3] }
  0x43   : > { %400 = vmatprep.subr.mxu0 %v327_v50  ;;  %560 = vmatpush1.msra.mxu1 %v1431_v60 }
  0x44   : > { %401 = vmatpush1.msra.mxu0 %v326_v52  ;;  %561 = vmatprep.subr.mxu1 %v1434_v61 }
  0x45   : > { %435 = vmatmul.mubr.f32.vlgmr.msra.gmra.mxu0 %v324_v54  ;;  %624 = vmatprep.subr.mxu0 %v1286_v15  ;;  %v510_v15 = vld [vmem:[#allocation3 + $0x198] sm:$0xff] }
  0x46   : > { %440 = vmatprep.mubr.f32.mxu0 %v1128_v0  ;;  %625 = vmatpush1.msra.mxu0 %v1288_v16  ;;  %v1445_v0 = vld [vmem:[#allocation3 + $0x10] sm:$0xff] }
  0x47   : > { %626 = vmatprep.subr.mxu0 %v1294_v18  ;;  %562 = vmatpush1.msra.mxu1 %v1438_v62  ;;  %v509_v16 = vld [vmem:[#allocation3 + $0x190] sm:$0xff]  ;;  %v507_v18 = vld [vmem:[#allocation3 + $0x180] sm:$0xff] }
  0x48   : > { %627 = vmatpush1.msra.mxu0 %v1296_v19  ;;  %563 = vmatprep.subr.mxu1 %v1442_v63  ;;  %v506_v19 = vld [vmem:[#allocation3 + $0x178] sm:$0xff] }
  0x49   : > { %441 = vmatmul.mubr.f32.gmra.mxu0 %v325_v59  ;;  %628 = vmatprep.subr.mxu0 %v1303_v21  ;;  %v504_v21 = vld [vmem:[#allocation3 + $0x168] sm:$0xff]  ;;  %v728_v59 = vld [vmem:[%s1681_s5 + $0x78] sm:$0xff] }
  0x4a   : > { %564 = vmatpush1.msra.mxu1 %v1445_v0  ;;  %629 = vmatpush1.msra.mxu0 %v1309_v23  ;;  %v502_v23 = vld [vmem:[#allocation3 + $0x158] sm:$0xff] }
  0x4b   : > { %565 = vmatprep.subr.mxu1 %v1449_v1  ;;  %630 = vmatprep.subr.mxu0 %v1315_v25  ;;  %v500_v25 = vld [vmem:[#allocation3 + $0x148] sm:$0xff] }
  0x4c   : > { %566 = vmatpush1.msra.mxu1 %v1453_v2  ;;  %631 = vmatpush1.msra.mxu0 %v1327_v27  ;;  %v498_v27 = vld [vmem:[#allocation3 + $0x138] sm:$0xff] }
  0x4d   : > { %567 = vmatprep.subr.mxu1 %v1457_v3  ;;  %632 = vmatprep.subr.mxu0 %v1333_v29  ;;  %v496_v29 = vld [vmem:[#allocation3 + $0x128] sm:$0xff] }
  0x4e   : > { %568 = vmatpush2.msra.mxu1 %v1461_v4  ;;  %633 = vmatpush1.msra.mxu0 %v1339_v31  ;;  %v494_v31 = vld [vmem:[#allocation3 + $0x118] sm:$0xff] }
  0x4f   : > { %569 = vmatprep.subr.mxu1 %v1465_v5  ;;  %634 = vmatprep.subr.mxu0 %v1345_v33  ;;  %v492_v33 = vld [vmem:[#allocation3 + $0x108] sm:$0xff] }
  0x50   : > { %570 = vmatpush2.msra.mxu1 %v1469_v6  ;;  %635 = vmatpush1.msra.mxu0 %v1357_v35  ;;  %v360_v35 = vlaneseq }
  0x51   : > { %571 = vmatprep.subr.mxu1 %v1473_v7  ;;  %636 = vmatprep.subr.mxu0 %v1363_v37 }
  0x52   : > { %572 = vmatpush2.msra.mxu1 %v1477_v8  ;;  %637 = vmatpush1.msra.mxu0 %v1369_v39  ;;  %v1510_v36 = vshrl.u32 %v360_v35, 7 }
  0x53   : > { %573 = vmatprep.subr.mxu1 %v516_v9  ;;  %638 = vmatprep.subr.mxu0 %v1375_v41 }
  0x54   : > { %574 = vmatpush2.msra.mxu1 %v515_v10  ;;  %639 = vmatpush1.msra.mxu0 %v1382_v43  ;;  %v362_v37 = vsub.s32 0, %v1510_v36  ;;  %v366_v39 = vsub.s32 1, %v1510_v36  ;;  %v717_v36 = vld [vmem:[%s1681_s5 + $0x20] sm:$0xff] }
  0x55   : > { %575 = vmatprep.subr.mxu1 %v514_v11  ;;  %640 = vmatprep.subr.mxu0 %v1388_v45 }
  0x56   : > { %576 = vmatpush2.msra.mxu1 %v513_v12  ;;  %641 = vmatpush1.msra.mxu0 %v1394_v47  ;;  %v363_v40 = vrot.slane %v358_v38, %v362_v37  ;;  %v367_v41 = vrot.slane %v358_v38, %v366_v39  ;;  %v716_v38 = vld [vmem:[%s1681_s5 + $0x18] sm:$0xff] }
  0x57   : > { %577 = vmatprep.subr.mxu1 %v512_v13  ;;  %642 = vmatprep.subr.mxu0 %v1403_v49 }
  0x58   : > { %578 = vmatpush2.msra.mxu1 %v511_v14  ;;  %643 = vmatpush1.msra.mxu0 %v1409_v51 }
  0x59   : > { %579 = vmatprep.subr.mxu1 %v510_v15  ;;  %644 = vmatprep.subr.mxu0 %v1415_v53 }
  0x5a   : > { %580 = vmatpush2.msra.mxu1 %v509_v16  ;;  %645 = vmatpush1.msra.mxu0 %v1418_v55 }
  0x5b   : > { %581 = vmatprep.subr.mxu1 %v508_v17  ;;  %646 = vmatprep.subr.mxu0 %v1421_v56 }
  0x5c   : > { %582 = vmatpush2.msra.mxu1 %v507_v18  ;;  %647 = vmatpush1.msra.mxu0 %v1424_v57 }
  0x5d   : > { %583 = vmatprep.subr.mxu1 %v506_v19  ;;  %648 = vmatprep.subr.mxu0 %v1427_v58  ;;  %v744_v58 = vld [vmem:[%s1681_s5 + $0xf8] sm:$0xff] }
  0x5e   : > { %584 = vmatpush2.msra.mxu1 %v505_v20  ;;  %649 = vmatpush1.msra.mxu0 %v1431_v60  ;;  %v743_v60 = vld [vmem:[%s1681_s5 + $0xf0] sm:$0xff] }
  0x5f   : > { %585 = vmatprep.subr.mxu1 %v504_v21  ;;  %650 = vmatprep.subr.mxu0 %v1434_v61  ;;  %v727_v61 = vld [vmem:[%s1681_s5 + $0x70] sm:$0xff] }
  0x60   : > { %586 = vmatpush2.msra.mxu1 %v503_v22  ;;  %651 = vmatpush1.msra.mxu0 %v1438_v62  ;;  %v742_v62 = vld [vmem:[%s1681_s5 + $0xe8] sm:$0xff] }
  0x61   : > { %587 = vmatprep.subr.mxu1 %v502_v23  ;;  %652 = vmatprep.subr.mxu0 %v1442_v63  ;;  %v726_v63 = vld [vmem:[%s1681_s5 + $0x68] sm:$0xff] }
  0x62   : > { %588 = vmatpush2.msra.mxu1 %v501_v24  ;;  %653 = vmatpush1.msra.mxu0 %v1445_v0  ;;  %v741_v0 = vld [vmem:[%s1681_s5 + $0xe0] sm:$0xff] }
  0x63   : > { %589 = vmatprep.subr.mxu1 %v500_v25  ;;  %654 = vmatprep.subr.mxu0 %v1449_v1  ;;  %v725_v1 = vld [vmem:[%s1681_s5 + $0x60] sm:$0xff] }
  0x64   : > { %655 = vmatpush1.msra.mxu0 %v1453_v2  ;;  %590 = vmatpush2.msra.mxu1 %v499_v26  ;;  %v740_v2 = vld [vmem:[%s1681_s5 + $0xd8] sm:$0xff] }
  0x65   : > { %656 = vmatprep.subr.mxu0 %v1457_v3  ;;  %591 = vmatprep.subr.mxu1 %v498_v27  ;;  %v724_v3 = vld [vmem:[%s1681_s5 + $0x58] sm:$0xff] }
  0x66   : > { %657 = vmatpush2.msra.mxu0 %v1461_v4  ;;  %592 = vmatpush2.msra.mxu1 %v497_v28  ;;  %v739_v4 = vld [vmem:[%s1681_s5 + $0xd0] sm:$0xff] }
  0x67   : > { %658 = vmatprep.subr.mxu0 %v1465_v5  ;;  %593 = vmatprep.subr.mxu1 %v496_v29  ;;  %v723_v5 = vld [vmem:[%s1681_s5 + $0x50] sm:$0xff] }
  0x68   : > { %659 = vmatpush2.msra.mxu0 %v1469_v6  ;;  %594 = vmatpush2.msra.mxu1 %v495_v30  ;;  %v738_v6 = vld [vmem:[%s1681_s5 + $0xc8] sm:$0xff] }
  0x69   : > { %660 = vmatprep.subr.mxu0 %v1473_v7  ;;  %595 = vmatprep.subr.mxu1 %v494_v31  ;;  %v722_v7 = vld [vmem:[%s1681_s5 + $0x48] sm:$0xff] }
  0x6a   : > { %661 = vmatpush2.msra.mxu0 %v1477_v8  ;;  %596 = vmatpush2.msra.mxu1 %v493_v32  ;;  %v737_v8 = vld [vmem:[%s1681_s5 + $0xc0] sm:$0xff] }
  0x6b   : > { %662 = vmatprep.subr.mxu0 %v516_v9  ;;  %597 = vmatprep.subr.mxu1 %v492_v33  ;;  %v721_v9 = vld [vmem:[%s1681_s5 + $0x40] sm:$0xff] }
  0x6c   : > { %663 = vmatpush2.msra.mxu0 %v515_v10  ;;  %598 = vmatpush2.msra.mxu1 %v491_v34  ;;  %v736_v10 = vld [vmem:[%s1681_s5 + $0xb8] sm:$0xff] }
  0x6d   : > { %664 = vmatprep.subr.mxu0 %v514_v11  ;;  %940 = vmatprep.subr.mxu1 %v744_v58  ;;  %v720_v11 = vld [vmem:[%s1681_s5 + $0x38] sm:$0xff] }
  0x6e   : > { %665 = vmatpush2.msra.mxu0 %v513_v12  ;;  %v735_v12 = vld [vmem:[%s1681_s5 + $0xb0] sm:$0xff] }
  0x6f   : > { %666 = vmatprep.subr.mxu0 %v512_v13  ;;  %v719_v13 = vld [vmem:[%s1681_s5 + $0x30] sm:$0xff] }
  0x70   : > { %667 = vmatpush2.msra.mxu0 %v511_v14  ;;  %v734_v14 = vld [vmem:[%s1681_s5 + $0xa8] sm:$0xff] }
  0x71   : > { %668 = vmatprep.subr.mxu0 %v510_v15  ;;  %v718_v15 = vld [vmem:[%s1681_s5 + $0x28] sm:$0xff] }
  0x72   : > { %669 = vmatpush2.msra.mxu0 %v509_v16  ;;  %v733_v16 = vld [vmem:[%s1681_s5 + $0xa0] sm:$0xff] }
  0x73   : > { %670 = vmatprep.subr.mxu0 %v508_v17  ;;  %v523_v17 = vld [vmem:[%s1680_s4] sm:$0x3] }
  0x74   : > { %671 = vmatpush2.msra.mxu0 %v507_v18  ;;  %v528_v18 = vrot.slane %v523_v17, %v362_v37  ;;  %v732_v37 = vld [vmem:[%s1681_s5 + $0x98] sm:$0xff] }
  0x75   : > { %672 = vmatprep.subr.mxu0 %v506_v19  ;;  %v532_v19 = vrot.slane %v523_v17, %v366_v39  ;;  %v731_v39 = vld [vmem:[%s1681_s5 + $0x90] sm:$0xff] }
  0x76   : > { %673 = vmatpush2.msra.mxu0 %v505_v20 }
  0x77   : > { %674 = vmatprep.subr.mxu0 %v504_v21 }
  0x78   : > { %675 = vmatpush2.msra.mxu0 %v503_v22 }
  0x79   : > { %676 = vmatprep.subr.mxu0 %v502_v23 }
  0x7a   : > { %677 = vmatpush2.msra.mxu0 %v501_v24 }
  0x7b   : > { %678 = vmatprep.subr.mxu0 %v500_v25 }
  0x7c   : > { %679 = vmatpush2.msra.mxu0 %v499_v26 }
  0x7d   : > { %680 = vmatprep.subr.mxu0 %v498_v27 }
  0x7e   : > { %681 = vmatpush2.msra.mxu0 %v497_v28 }
  0x7f   : > { %682 = vmatprep.subr.mxu0 %v496_v29 }
  0x80   : > { %683 = vmatpush2.msra.mxu0 %v495_v30 }
  0x81   : > { %684 = vmatprep.subr.mxu0 %v494_v31 }
  0x82   : > { %685 = vmatpush2.msra.mxu0 %v493_v32 }
  0x83   : > { %686 = vmatprep.subr.mxu0 %v492_v33 }
  0x84   : > { %687 = vmatpush2.msra.mxu0 %v491_v34 }
 0x105   : > { %v436_v42 = vpop.f32.mrf.mxu0 }
 0x106   : > { %v437_v43 = vadd.f32 %v436_v42, %v363_v40  ;;  %v714_v42 = vld [vmem:[%s1681_s5 + $0x8] sm:$0xff] }
 0x107   : > { %v438_v44 = vpop.f32.mrf.mxu0 }
 0x108   : > { %v439_v45 = vadd.f32 %v438_v44, %v367_v41  ;;  %v451_v46 = vmul.f32 0.001, %v437_v43  ;;  %vm447_vm1 = vcmp.gt.f32.partialorder %v437_v43, 0.0  ;;  %v713_v44 = vld [vmem:[%s1681_s5] sm:$0xff] }
 0x109   : > { %v442_v47 = vpop.f32.mrf.mxu0 }
 0x10a   : > { %v443_v48 = vadd.f32 %v442_v47, %v363_v40  ;;  %vm448_vm0 = vcmp.gt.f32.partialorder %v439_v45, 0.0  ;;  %v452_v49 = vmul.f32 0.001, %v439_v45  ;;  %v455_v54 = vsel %vm447_vm1, %v437_v43, %v451_v46  ;;  %v715_v40 = vld [vmem:[%s1681_s5 + $0x10] sm:$0xff]  ;;  %v729_v43 = vld [vmem:[%s1681_s5 + $0x80] sm:$0xff] }
 0x10b   : > { %v444_v50 = vpop.f32.mrf.mxu0 }
 0x10c   : > { %v445_v51 = vadd.f32 %v444_v50, %v367_v41  ;;  %v456_v52 = vsel %vm448_vm0, %v439_v45, %v452_v49  ;;  %v453_v53 = vmul.f32 0.001, %v443_v48  ;;  %vm449_vm3 = vcmp.gt.f32.partialorder %v443_v48, 0.0  ;;  %v730_v41 = vld [vmem:[%s1681_s5 + $0x88] sm:$0xff] }
 0x10d   : > { %599 = vmatprep.mubr.f32.mxu1 %v456_v52 }
 0x10e   : > { %v454_v55 = vmul.f32 0.001, %v445_v51  ;;  %600 = vmatmul.mubr.f32.vlgmr.msra.gmra.mxu1 %v455_v54  ;;  %vm450_vm2 = vcmp.gt.f32.partialorder %v445_v51, 0.0  ;;  %v457_v57 = vsel %vm449_vm3, %v443_v48, %v453_v53 }
 0x10f   : > { %941 = vmatpush3.msra.mxu1 %v728_v59 }
 0x110   : > { %v458_v56 = vsel %vm450_vm2, %v445_v51, %v454_v55  ;;  %942 = vmatprep.subr.mxu1 %v743_v60 }
 0x111   : > { %605 = vmatprep.mubr.f32.mxu1 %v458_v56  ;;  %943 = vmatpush3.msra.mxu1 %v727_v61 }
 0x112   : > { %606 = vmatmul.mubr.f32.gmra.mxu1 %v457_v57  ;;  %944 = vmatprep.subr.mxu1 %v742_v62  ;;  %v933_v62 = vld [vmem:[%s1682_s6] ss:$0 sm:$0xff] }
 0x113   : > { %945 = vmatpush3.msra.mxu1 %v726_v63 }
 0x114   : > { %946 = vmatprep.subr.mxu1 %v741_v0 }
 0x115   : > { %947 = vmatpush3.msra.mxu1 %v725_v1 }
 0x116   : > { %948 = vmatprep.subr.mxu1 %v740_v2 }
 0x117   : > { %949 = vmatpush3.msra.mxu1 %v724_v3 }
 0x118   : > { %950 = vmatprep.subr.mxu1 %v739_v4 }
 0x119   : > { %951 = vmatpush3.msra.mxu1 %v723_v5 }
 0x11a   : > { %952 = vmatprep.subr.mxu1 %v738_v6 }
 0x11b   : > { %953 = vmatpush3.msra.mxu1 %v722_v7 }
 0x11c   : > { %954 = vmatprep.subr.mxu1 %v737_v8 }
 0x11d   : > { %955 = vmatpush3.msra.mxu1 %v721_v9 }
 0x11e   : > { %956 = vmatprep.subr.mxu1 %v736_v10 }
 0x11f   : > { %957 = vmatpush3.msra.mxu1 %v720_v11 }
 0x120   : > { %958 = vmatprep.subr.mxu1 %v735_v12 }
 0x121   : > { %959 = vmatpush3.msra.mxu1 %v719_v13 }
 0x122   : > { %960 = vmatprep.subr.mxu1 %v734_v14 }
 0x123   : > { %961 = vmatpush3.msra.mxu1 %v718_v15 }
 0x124   : > { %962 = vmatprep.subr.mxu1 %v733_v16 }
 0x125   : > { %963 = vmatpush3.msra.mxu1 %v717_v36 }
 0x126   : > { %964 = vmatprep.subr.mxu1 %v732_v37 }
 0x127   : > { %965 = vmatpush3.msra.mxu1 %v716_v38 }
 0x128   : > { %966 = vmatprep.subr.mxu1 %v731_v39 }
 0x129   : > { %967 = vmatpush3.msra.mxu1 %v715_v40 }
 0x12a   : > { %968 = vmatprep.subr.mxu1 %v730_v41 }
 0x12b   : > { %969 = vmatpush3.msra.mxu1 %v714_v42 }
 0x12c   : > { %970 = vmatprep.subr.mxu1 %v729_v43 }
 0x12d   : > { %971 = vmatpush3.msra.mxu1 %v713_v44 }
 0x1ce   : > { %v601_v20 = vpop.f32.mrf.mxu1 }
 0x1cf   : > { %v602_v21 = vadd.f32 %v601_v20, %v528_v18 }
 0x1d0   : > { %v603_v22 = vpop.f32.mrf.mxu1 }
 0x1d1   : > { %v604_v23 = vadd.f32 %v603_v22, %v532_v19  ;;  %v616_v24 = vmul.f32 0.001, %v602_v21  ;;  %vm612_vm4 = vcmp.gt.f32.partialorder %v602_v21, 0.0 }
 0x1d2   : > { %v607_v25 = vpop.f32.mrf.mxu1 }
 0x1d3   : > { %v617_v26 = vmul.f32 0.001, %v604_v23  ;;  %v608_v27 = vadd.f32 %v607_v25, %v528_v18  ;;  %vm613_vm5 = vcmp.gt.f32.partialorder %v604_v23, 0.0  ;;  %v620_v31 = vsel %vm612_vm4, %v602_v21, %v616_v24 }
 0x1d4   : > { %v609_v28 = vpop.f32.mrf.mxu1 }
 0x1d5   : > { %v610_v29 = vadd.f32 %v609_v28, %v532_v19  ;;  %v621_v30 = vsel %vm613_vm5, %v604_v23, %v617_v26  ;;  %v618_v32 = vmul.f32 0.001, %v608_v27  ;;  %vm614_vm7 = vcmp.gt.f32.partialorder %v608_v27, 0.0 }
 0x1d6   : > { %688 = vmatprep.mubr.f32.mxu0 %v621_v30 }
 0x1d7   : > { %v619_v33 = vmul.f32 0.001, %v610_v29  ;;  %689 = vmatmul.mubr.f32.vlgmr.msra.gmra.mxu0 %v620_v31  ;;  %vm615_vm6 = vcmp.gt.f32.partialorder %v610_v29, 0.0  ;;  %v622_v35 = vsel %vm614_vm7, %v608_v27, %v618_v32 }
 0x1d9   : > { %v623_v34 = vsel %vm615_vm6, %v610_v29, %v619_v33 }
 0x1da   : > { %694 = vmatprep.mubr.f32.mxu0 %v623_v34 }
 0x1db   : > { %695 = vmatmul.mubr.f32.gmra.mxu0 %v622_v35 }
 0x297   : > { %v690_v45 = vpop.f32.mrf.mxu0 }
 0x298   : > { %v691_v46 = vadd.f32 %v690_v45, %v528_v18 }
 0x299   : > { %v692_v47 = vpop.f32.mrf.mxu0 }
 0x29a   : > { %v693_v48 = vadd.f32 %v692_v47, %v532_v19  ;;  %v705_v49 = vmul.f32 0.001, %v691_v46  ;;  %vm701_vm8 = vcmp.gt.f32.partialorder %v691_v46, 0.0 }
 0x29b   : > { %v696_v50 = vpop.f32.mrf.mxu0 }
 0x29c   : > { %v706_v51 = vmul.f32 0.001, %v693_v48  ;;  %v697_v52 = vadd.f32 %v696_v50, %v528_v18  ;;  %vm702_vm9 = vcmp.gt.f32.partialorder %v693_v48, 0.0  ;;  %v709_v56 = vsel %vm701_vm8, %v691_v46, %v705_v49 }
 0x29d   : > { %v698_v53 = vpop.f32.mrf.mxu0 }
 0x29e   : > { %v699_v54 = vadd.f32 %v698_v53, %v532_v19  ;;  %v710_v55 = vsel %vm702_vm9, %v693_v48, %v706_v51  ;;  %v707_v57 = vmul.f32 0.001, %v697_v52  ;;  %vm703_vm11 = vcmp.gt.f32.partialorder %v697_v52, 0.0 }
 0x29f   : > { %816 = vmatprep.mubr.f32.mxu1 %v710_v55 }
 0x2a0   : > { %v708_v58 = vmul.f32 0.001, %v699_v54  ;;  %817 = vmatmul.mubr.f32.vlgmr.msra.gmra.mxu1 %v709_v56  ;;  %vm704_vm10 = vcmp.gt.f32.partialorder %v699_v54, 0.0  ;;  %v711_v60 = vsel %vm703_vm11, %v697_v52, %v707_v57 }
 0x2a2   : > { %v712_v59 = vsel %vm704_vm10, %v699_v54, %v708_v58 }
 0x2a3   : > { %821 = vmatprep.mubr.f32.mxu1 %v712_v59 }
 0x2a4   : > { %822 = vmatmul.mubr.f32.gmra.mxu1 %v711_v60 }
 0x360   : > { %v972_v61 = vpop.f32.mrf.mxu1 }
 0x362   : > { %v973_v63 = vpop.f32.mrf.mxu1 }
 0x363   : > { %v974_v0 = vadd.f32 %v973_v63, %v972_v61 }
 0x364   : > { %v975_v1 = vpop.f32.mrf.mxu1 }
 0x365   : > { %v819_v2 = vadd.f32 %v974_v0, %v933_v62 }
 0x366   : > { %v976_v3 = vpop.f32.mrf.mxu1 }
 0x367   : > { %vm827_vm12 = vcmp.gt.f32.partialorder %v819_v2, 0.0  ;;  %v829_v4 = vmul.f32 0.001, %v819_v2  ;;  %v977_v5 = vadd.f32 %v976_v3, %v975_v1 }
 0x369   : > { %v831_v6 = vsel %vm827_vm12, %v819_v2, %v829_v4  ;;  %v824_v7 = vadd.f32 %v977_v5, %v933_v62 }
 0x36a   : > { %834 = vst.msk [vmem:[%s316_s12] sm:$0xff] %vm833_vm13, %v831_v6 }
 0x36b   : > { %vm828_vm14 = vcmp.gt.f32.partialorder %v824_v7, 0.0  ;;  %v830_v8 = vmul.f32 0.001, %v824_v7 }
 0x36d   : > { %v832_v9 = vsel %vm828_vm14, %v824_v7, %v830_v8 }
 0x36e   : > { %835 = vst.msk [vmem:[%s316_s12 + $0x8] sm:$0xff] %vm833_vm13, %v832_v9 }
 0x36f   : > { %1072 = shalt.err (!%p1069_p0)
}
 0x370   : > { %s1073_s23 = scalar_lea.hbm %s1632_s18, 256  ;;  %s1077_s26 = scalar_lea.hbm %s1684_s8, 512 }
 0x371   : > { %p1074_p1 = scmp.ne.s32.totalorder %s1632_s18, %s1073_s23  ;;  %p1078_p4 = scmp.lt.s32.totalorder %s1632_s18, %s1684_s8 }
 0x372   : > { %p1079_p7 = scmp.lt.s32.totalorder %s1077_s26, %s1073_s23 }
 0x373   : > { %p1075_p2 = pnand %p1074_p1, %p1215_p5 }
 0x374   : > { %p1080_p6 = por %p1079_p7, %p1078_p4 }
 0x375   : > { %p1076_p3 = pneg %p1075_p2 }
 0x377   : > { %p1081_p8 = pnand %p1080_p6, %p1076_p3 }
 0x379   : > { %1084 = shalt.err (!%p1081_p8)
}
 0x37a   : > { %s1130_s11 = smov 128   ;;  %s1131_s17 = smov 8  }
 0x37b   : > { %982 = dma.vmem_to_hbm [thread:$0]  (%p1215_p5), %s1634_s16, 256, %s1632_s18, %s1636_s7, %s1130_s11, %s1130_s11, %s1131_s17  }
 0x37c PF: > { %p994_p9 = scmp.ge.s32.totalorder %s1123_s30, 2  ;;  %s865_s19 = sand.u32 1, %s1111_s27  }
 0x37d   : > { %p1689_p10 = scmp.ne.s32.totalorder %s1686_s15, 0  ;;  %s866_s20 = scalar_lea.sflag [#allocation5], %s865_s19 }
 0x37f   : > { %p989_p11 = pnand %p994_p9, %p1689_p10 }
 0x381   : > { %p990_p12 = pneg %p989_p11 }
 0x383   : > { %1106 = dma.done.wait (%p990_p12), %s866_s20, 256  }
 0x384   : > { %1108 = vsyncadd (%p990_p12), %s866_s20, 4294967040  ;;  %p21_p13 = scmp.ge.s32.totalorder %s1202_s10, 4   ;;  %s1690_s27 = smov %s1115_s28 }
 0x385   : > { %s1691_s28 = smov %s1119_s29  ;;  %s1692_s29 = smov %s1213_s13 }
 0x386   : > { %s1693_s30 = smov %s1202_s10  ;;  %23 = sbr.rel (!%p21_p13) target bundleno = 4 (0x4), region = 92 }
 0x38b   :  { %871 = vsyncpa [#allocation4], 1 }
 0x38c   :  { %873 = vsyncpa [#allocation4 + $0x1], 1 }
 0x38d   :  { %874 = vsyncpa [#allocation5], 1 }
 0x38e   :  { %876 = vsyncpa [#allocation5 + $0x1], 1 }

</bundles_post_ra>
